<compile_context>
chip_gen: v7x
topology: tpu7x:2x2x1
jax: 0.10.0
libtpu: 0.0.40
codegen_flags: <defaults>
</compile_context>

<pallas_src>
import functools
import math

import jax
import jax.numpy as jnp
from jax.experimental import pallas as pl
from jax.experimental.pallas import tpu as pltpu


def attention_dropout_kernel(seed_ref, q_ref, k_ref, v_ref, pmat_ref, o_ref, *,
                             head_dim, dropout_p):
    # Block refs: q/k/v/o are (Bt, qk_dim, L); pmat is (L, L) f32.
    q = q_ref[...]
    k = k_ref[...]

    # s[b, i, j] = sum_l q[b, i, l] * k[b, j, l]  (contract over L; no k.T).
    s = jax.lax.dot_general(q, k, (((2,), (2,)), ((0,), (0,))),
                            preferred_element_type=jnp.float32)
    s = s * (1.0 / math.sqrt(head_dim))

    # Softmax over the last dim (f32 VPU/EUP math).
    m = jnp.max(s, axis=-1, keepdims=True)
    e = jnp.exp(s - m)
    denom = jnp.sum(e, axis=-1, keepdims=True)

    if dropout_p > 0.0:
        # Fold the dropout rescale 1/(1-p) into the softmax normalization.
        p = e * ((1.0 / (1.0 - dropout_p)) / denom)

        # Portable counter-based hash RNG (VPU integer ops only, works in both
        # compiled and interpret modes).
        # TODO(synk): mask pattern differs from torch's RNG; statistics match.
        bt, qk, _ = p.shape
        i0 = jax.lax.broadcasted_iota(jnp.uint32, p.shape, 0)
        i1 = jax.lax.broadcasted_iota(jnp.uint32, p.shape, 1)
        i2 = jax.lax.broadcasted_iota(jnp.uint32, p.shape, 2)
        pid = pl.program_id(0).astype(jnp.uint32)
        idx = ((pid * jnp.uint32(bt) + i0) * jnp.uint32(qk) + i1) \
            * jnp.uint32(qk) + i2
        x = idx * jnp.uint32(2654435761)
        x = x + seed_ref[0].astype(jnp.uint32) * jnp.uint32(0x9E3779B1)
        x = x ^ (x >> jnp.uint32(16))
        x = x * jnp.uint32(0x7FEB352D)
        x = x ^ (x >> jnp.uint32(15))
        x = x * jnp.uint32(0x846CA68B)
        x = x ^ (x >> jnp.uint32(16))
        # Keep iff hash >= dropout_p * 2^32 (pure integer-domain decision).
        thresh = jnp.uint32(min(int(round(dropout_p * (1 << 32))),
                                (1 << 32) - 1))
        p = jnp.where(x >= thresh, p, 0.0)
    else:
        p = e / denom

    # PV matmul in the inputs' native dtype (bf16 inputs stay on fast MXU).
    out = jax.lax.dot_general(p.astype(v_ref.dtype), v_ref[...],
                              (((2,), (1,)), ((0,), (0,))),
                              preferred_element_type=jnp.float32)

    # Fused (h, r) -> (r, h) lane permutation via an exact 0/1 matrix on the
    # MXU: out_perm[..., rr*h + hh] = out[..., hh*r + rr].  Keeps the store a
    # single dense 128-lane slab so the wrapper reshape is free (no transpose).
    out = jax.lax.dot_general(out, pmat_ref[...],
                              (((2,), (0,)), ((), ())),
                              preferred_element_type=jnp.float32)
    o_ref[...] = out.astype(o_ref.dtype)


def _vmem_usage_bytes(bt, qk_dim, L, itemsize):
    """Estimated live VMEM for one grid step (double-buffered blocks + temps)."""
    blocks = 2 * 4 * bt * qk_dim * L * itemsize      # dbl-buffered q/k/v/o blocks
    pmat = 2 * L * L * 4                             # permutation matrix (f32)
    # f32 intermediates: s, e, p, hash bits, keep mask (~5x qk^2) + f32 out
    # accumulator and its permuted copy (2x qk*L).
    inter = bt * (5 * qk_dim * qk_dim * 4 + 2 * qk_dim * L * 4)
    return blocks + pmat + inter


def _vmem_budget_bytes():
    """Per-generation block budget: ~48 MiB on 128-MiB parts (v5e/v6e),
    ~24 MiB on 64-MiB parts (v7x), conservative 24 MiB if unknown."""
    cap = None
    try:
        cap = getattr(pltpu.get_tpu_info(), "vmem_capacity_bytes", None)
    except Exception:
        cap = None
    if not cap:
        return 24 << 20
    return int(min(48 << 20, (cap * 3) // 8))


def _pick_batch_tile(batch_dim, qk_dim, L, itemsize, budget_bytes):
    """Largest divisor of batch_dim fitting the budget, keeping grid >= 2 when
    batch_dim >= 2 (pipelining overlap + v7x dual-TC sharding)."""
    max_bt = batch_dim if batch_dim < 2 else max(1, batch_dim // 2)
    bt = 1
    for cand in range(1, batch_dim + 1):
        if batch_dim % cand != 0 or cand > max_bt:
            continue
        if _vmem_usage_bytes(cand, qk_dim, L, itemsize) <= budget_bytes:
            bt = cand
    return bt


def _perm_matrix(h, r):
    # P[l, lp] = 1 iff lp == (l % r) * h + (l // r), i.e. the (h, r)->(r, h)
    # transpose of the flattened L = h*r axis.
    L = h * r
    l_idx = jnp.arange(L)
    lp = (l_idx % r) * h + (l_idx // r)
    return jax.nn.one_hot(lp, L, dtype=jnp.float32)


def model_forward(query, key, value, *, batch_dim, num_heads, head_dim,
                  dropout_p, seed=0):
    qk_dim = num_heads * head_dim
    h = query.shape[2]
    r = key.shape[3]
    L = h * r
    dropout_p = float(dropout_p)

    if dropout_p >= 1.0:
        # F.dropout with p=1 zeroes everything: skip the kernel and all DMAs.
        return jnp.zeros((batch_dim, num_heads, head_dim, r, h),
                         dtype=query.dtype)

    q2 = query.reshape(batch_dim, qk_dim, L)
    k2 = key.reshape(batch_dim, qk_dim, L)
    v2 = value.reshape(batch_dim, qk_dim, L)
    pmat = _perm_matrix(h, r)
    seed_arr = jnp.asarray([seed], dtype=jnp.int32)

    budget = _vmem_budget_bytes()
    bt = _pick_batch_tile(batch_dim, qk_dim, L, q2.dtype.itemsize, budget)
    usage = _vmem_usage_bytes(bt, qk_dim, L, q2.dtype.itemsize)
    # TODO(synk): if even bt=1 exceeds the budget (very large h*r on v7x),
    # add a fallback tiling over L with a score accumulator instead of relying
    # on a raised vmem_limit.
    vmem_limit = int(max(budget, usage) + (8 << 20))
    grid = (batch_dim // bt,)

    kern = functools.partial(attention_dropout_kernel,
                             head_dim=head_dim, dropout_p=dropout_p)

    out = pl.pallas_call(
        kern,
        out_shape=jax.ShapeDtypeStruct((batch_dim, qk_dim, L), query.dtype),
        grid_spec=pltpu.PrefetchScalarGridSpec(
            num_scalar_prefetch=1,
            grid=grid,
            in_specs=[
                pl.BlockSpec((bt, qk_dim, L), lambda b, _seed: (b, 0, 0)),
                pl.BlockSpec((bt, qk_dim, L), lambda b, _seed: (b, 0, 0)),
                pl.BlockSpec((bt, qk_dim, L), lambda b, _seed: (b, 0, 0)),
                pl.BlockSpec((L, L), lambda b, _seed: (0, 0)),
            ],
            out_specs=pl.BlockSpec((bt, qk_dim, L), lambda b, _seed: (b, 0, 0)),
        ),
        compiler_params=pltpu.CompilerParams(
            dimension_semantics=("parallel",),
            vmem_limit_bytes=vmem_limit),
    )(seed_arr, q2, k2, v2, pmat)

    # Kernel already stored the (r, h)-ordered lane layout, so this reshape is
    # free (splits contiguous dims only; no XLA transpose).
    return out.reshape(batch_dim, num_heads, head_dim, r, h)


def reference_forward(query, key, value, *, batch_dim, num_heads, head_dim,
                      dropout_p):
    # Pure-JAX reference (deterministic only for dropout_p in {0, 1}).
    qk_dim = num_heads * head_dim
    h = query.shape[2]
    r = key.shape[3]
    L = h * r
    q2 = query.reshape(batch_dim, qk_dim, L).astype(jnp.float32)
    k2 = key.reshape(batch_dim, qk_dim, L).astype(jnp.float32)
    v2 = value.reshape(batch_dim, qk_dim, L).astype(jnp.float32)
    s = jnp.matmul(q2, jnp.swapaxes(k2, -2, -1)) / math.sqrt(head_dim)
    p = jax.nn.softmax(s, axis=-1)
    if dropout_p >= 1.0:
        p = jnp.zeros_like(p)
    out = jnp.matmul(p, v2).astype(query.dtype)
    out5 = out.reshape(batch_dim, num_heads, head_dim, h, r)
    return jnp.swapaxes(out5, 3, 4)


if __name__ == "__main__":
    # Module hyper-parameters from the PyTorch script.
    batch_dim = 1
    num_heads = 2
    k = 32            # head_dim
    t = 1             # module's dropout_p
    qk_dim = num_heads * k

    # Small spatial shape: h=8, r=16  ->  L = 128.
    h, r = 8, 16
    rng = jax.random.PRNGKey(0)
    kq, kk, kv = jax.random.split(rng, 3)
    query = jax.random.normal(kq, (batch_dim, qk_dim, h, r), dtype=jnp.float32)
    key = jax.random.normal(kk, (batch_dim, qk_dim, h, r), dtype=jnp.float32)
    value = jax.random.normal(kv, (batch_dim, qk_dim, h, r), dtype=jnp.float32)

    # 1) dropout_p = 0: validates QK^T / softmax / PV / fused permutation.
    out0 = jax.block_until_ready(model_forward(
        query, key, value, batch_dim=batch_dim, num_heads=num_heads,
        head_dim=k, dropout_p=0.0, seed=0))
    ref0 = reference_forward(query, key, value, batch_dim=batch_dim,
                             num_heads=num_heads, head_dim=k, dropout_p=0.0)
    assert out0.shape == (batch_dim, num_heads, k, r, h), out0.shape
    assert jnp.allclose(out0, ref0, atol=2e-3, rtol=2e-3)

    # 2) 0 < p < 1: exercises the portable hash-based dropout path.
    outd = jax.block_until_ready(model_forward(
        query, key, value, batch_dim=batch_dim, num_heads=num_heads,
        head_dim=k, dropout_p=0.5, seed=0))
    assert outd.shape == (batch_dim, num_heads, k, r, h), outd.shape
    assert bool(jnp.all(jnp.isfinite(outd)))

    # 3) Module config (t = 1): dropout_p >= 1 short-circuits to zeros.
    out1 = jax.block_until_ready(model_forward(
        query, key, value, batch_dim=batch_dim, num_heads=num_heads,
        head_dim=k, dropout_p=t, seed=0))
    ref1 = reference_forward(query, key, value, batch_dim=batch_dim,
                             num_heads=num_heads, head_dim=k, dropout_p=t)
    assert out1.shape == (batch_dim, num_heads, k, r, h), out1.shape
    assert jnp.allclose(out1, ref1, atol=1e-6, rtol=1e-6)

    print("KERNEL_OK")
</pallas_src>

<mosaic_0001>
module attributes {stable_mosaic.version = 11 : i64} {
  func.func @attention_dropout_kernel(%arg0: i32, %arg1: memref<1xi32, #tpu.memory_space<smem>>, %arg2: memref<1x64x128xf32, #tpu.memory_space<vmem>>, %arg3: memref<1x64x128xf32, #tpu.memory_space<vmem>>, %arg4: memref<1x64x128xf32, #tpu.memory_space<vmem>>, %arg5: memref<128x128xf32, #tpu.memory_space<vmem>>, %arg6: memref<1x64x128xf32, #tpu.memory_space<vmem>>) attributes {dimension_semantics = [#tpu.dimension_semantics<parallel>], iteration_bounds = array<i64: 1>, scalar_prefetch = 1 : i64, scratch_operands = 0 : i64, tpu.core_type = #tpu.core_type<tc>, window_params = [{transform_indices = @transform_0, window_bounds = array<i64: 1, 64, 128>}, {transform_indices = @transform_1, window_bounds = array<i64: 1, 64, 128>}, {transform_indices = @transform_2, window_bounds = array<i64: 1, 64, 128>}, {pipeline_mode = #tpu.pipeline_mode<synchronous>, transform_indices = @transform_3, window_bounds = array<i64: 128, 128>}, {transform_indices = @transform_4, window_bounds = array<i64: 1, 64, 128>}]} {
    %c0 = arith.constant 0 : index
    %c0_0 = arith.constant 0 : index
    %c0_1 = arith.constant 0 : index
    %0 = vector.load %arg2[%c0, %c0_0, %c0_1] : memref<1x64x128xf32, #tpu.memory_space<vmem>>, vector<1x64x128xf32>
    %c0_2 = arith.constant 0 : index
    %c0_3 = arith.constant 0 : index
    %c0_4 = arith.constant 0 : index
    %1 = vector.load %arg3[%c0_2, %c0_3, %c0_4] : memref<1x64x128xf32, #tpu.memory_space<vmem>>, vector<1x64x128xf32>
    %cst = arith.constant dense<0.000000e+00> : vector<1x64x64xf32>
    %2 = tpu.matmul %0, %1, %cst {dimension_numbers = #tpu.dot_dimension_numbers<[2], [2], [1], [1], [0, 0, 0, 1, 1, 1], [0], [0]>} : vector<1x64x128xf32>, vector<1x64x128xf32>, vector<1x64x64xf32> -> vector<1x64x64xf32>
    %cst_5 = arith.constant 0.176776692 : f32
    %3 = vector.broadcast %cst_5 : f32 to vector<1x64x64xf32>
    %4 = arith.mulf %2, %3 : vector<1x64x64xf32>
    %cst_6 = arith.constant dense<0xFF800000> : vector<1x64xf32>
    %5 = vector.multi_reduction <maximumf>, %4, %cst_6 [2] : vector<1x64x64xf32> to vector<1x64xf32>
    %6 = vector.shape_cast %5 : vector<1x64xf32> to vector<1x64x1xf32>
    %7 = vector.broadcast %6 : vector<1x64x1xf32> to vector<1x64x64xf32>
    %8 = arith.subf %4, %7 : vector<1x64x64xf32>
    %9 = math.exp %8 : vector<1x64x64xf32>
    %cst_7 = arith.constant dense<0.000000e+00> : vector<1x64xf32>
    %10 = vector.multi_reduction <add>, %9, %cst_7 [2] : vector<1x64x64xf32> to vector<1x64xf32>
    %11 = vector.shape_cast %10 : vector<1x64xf32> to vector<1x64x1xf32>
    %12 = vector.broadcast %11 : vector<1x64x1xf32> to vector<1x64x64xf32>
    %13 = arith.divf %9, %12 : vector<1x64x64xf32>
    %c0_8 = arith.constant 0 : index
    %c0_9 = arith.constant 0 : index
    %c0_10 = arith.constant 0 : index
    %14 = vector.load %arg4[%c0_8, %c0_9, %c0_10] : memref<1x64x128xf32, #tpu.memory_space<vmem>>, vector<1x64x128xf32>
    %cst_11 = arith.constant dense<0.000000e+00> : vector<1x64x128xf32>
    %15 = tpu.matmul %13, %14, %cst_11 {dimension_numbers = #tpu.dot_dimension_numbers<[2], [1], [1], [2], [0, 0, 0, 1, 1, 2], [0], [0]>} : vector<1x64x64xf32>, vector<1x64x128xf32>, vector<1x64x128xf32> -> vector<1x64x128xf32>
    %c0_12 = arith.constant 0 : index
    %c0_13 = arith.constant 0 : index
    %16 = vector.load %arg5[%c0_12, %c0_13] : memref<128x128xf32, #tpu.memory_space<vmem>>, vector<128x128xf32>
    %cst_14 = arith.constant dense<0.000000e+00> : vector<1x64x128xf32>
    %17 = tpu.matmul %15, %16, %cst_14 {dimension_numbers = #tpu.dot_dimension_numbers<[2], [0], [0, 1], [1], [0, 0, 0, 1, 1, 1], [], []>} : vector<1x64x128xf32>, vector<128x128xf32>, vector<1x64x128xf32> -> vector<1x64x128xf32>
    %c0_15 = arith.constant 0 : index
    %c0_16 = arith.constant 0 : index
    %c0_17 = arith.constant 0 : index
    %18 = vector.load %arg6[%c0_15, %c0_16, %c0_17] : memref<1x64x128xf32, #tpu.memory_space<vmem>>, vector<1x64x128xf32>
    tpu.vector_store %arg6[%c0_15, %c0_16, %c0_17], %17 {strides = array<i32>} : memref<1x64x128xf32, #tpu.memory_space<vmem>>, vector<1x64x128xf32>,
    return
  }
  func.func @transform_0(%arg0: i32, %arg1: memref<1xi32, #tpu.memory_space<smem>>) -> (i32, i32, i32) {
    %c0_i32 = arith.constant 0 : i32
    %c0_i32_0 = arith.constant 0 : i32
    %c0_i32_1 = arith.constant 0 : i32
    return %arg0, %c0_i32, %c0_i32_0 : i32, i32, i32
  }
  func.func @transform_1(%arg0: i32, %arg1: memref<1xi32, #tpu.memory_space<smem>>) -> (i32, i32, i32) {
    %c0_i32 = arith.constant 0 : i32
    %c0_i32_0 = arith.constant 0 : i32
    %c0_i32_1 = arith.constant 0 : i32
    return %arg0, %c0_i32, %c0_i32_0 : i32, i32, i32
  }
  func.func @transform_2(%arg0: i32, %arg1: memref<1xi32, #tpu.memory_space<smem>>) -> (i32, i32, i32) {
    %c0_i32 = arith.constant 0 : i32
    %c0_i32_0 = arith.constant 0 : i32
    %c0_i32_1 = arith.constant 0 : i32
    return %arg0, %c0_i32, %c0_i32_0 : i32, i32, i32
  }
  func.func @transform_3(%arg0: i32, %arg1: memref<1xi32, #tpu.memory_space<smem>>) -> (i32, i32) {
    %c0_i32 = arith.constant 0 : i32
    %c0_i32_0 = arith.constant 0 : i32
    %c0_i32_1 = arith.constant 0 : i32
    return %c0_i32, %c0_i32_0 : i32, i32
  }
  func.func @transform_4(%arg0: i32, %arg1: memref<1xi32, #tpu.memory_space<smem>>) -> (i32, i32, i32) {
    %c0_i32 = arith.constant 0 : i32
    %c0_i32_0 = arith.constant 0 : i32
    %c0_i32_1 = arith.constant 0 : i32
    return %arg0, %c0_i32, %c0_i32_0 : i32, i32, i32
  }
}

</mosaic_0001>

<bundles_post_ra>
// kernel: tpu_custom_call.1
= control target key start
LH: loop header
LB: loop body
LE: loop exit
PB: predicated region body
PF: predicated region fallthrough
CT: control target
= control target key end

     0   :  { %11 = vsyncpa [#allocation5], 0  ;;  %s1145_s0 = inlined_call_operand.<no memory space> [shape: s32[1], index: 0, kind: input, shape index: {}]   ;;  %s1146_s1 = inlined_call_operand.hbm [shape: f32[1,64,128], index: 1, kind: input, shape index: {}]   ;;  %s1147_s2 = inlined_call_operand.hbm [shape: f32[1,64,128], index: 2, kind: input, shape index: {}]   ;;  %s1148_s3 = inlined_call_operand.hbm [shape: f32[1,64,128], index: 3, kind: input, shape index: {}]   ;;  %s1149_s4 = inlined_call_operand.hbm [shape: f32[128,128], index: 4, kind: input, shape index: {}]   ;;  %s1150_s5 = inlined_call_operand.hbm [shape: f32[1,64,128], index: 5, kind: output, shape index: {}]  }
   0x1   :  { %12 = vsyncpa [#allocation8], 0 }
   0x2   :  { %13 = vsyncpa [#allocation11], 0 }
   0x3   :  { %14 = vsyncpa [#allocation6], 0  ;;  %s963_s0 = smov [#allocation7]   ;;  %s964_s19 = smov [#allocation4]  }
   0x4   :  { %s32_s18 = sshll.u32 %s963_s0, 4  ;;  %s20_s20 = sshll.u32 %s964_s19, 4  ;;  %s33_s18 = int_to_ptr.vmem [resolvable:$true] %s32_s18  ;;  %s1000_s20 = int_to_ptr.vmem [resolvable:$true] %s20_s20 }
   0x5   :  { %s845_s23 = scalar_lea.hbm %s1147_s2, 1024 }
   0x6   :  { %p846_p0 = scmp.ne.s32.totalorder %s1147_s2, %s845_s23  ;;  %p849_p1 = scmp.lt.u32.totalorder %s845_s23, %s1147_s2 }
   0x8   :  { %p851_p2 = pnand %p849_p1, %p846_p0 }
   0xa   :  { %854 = shalt.err (!%p851_p2)
}
   0xb   :  { %s855_s28 = scalar_lea.vmem %s33_s18, 1024  ;;  %p860_p4 = scmp.lt.s32.totalorder %s33_s18, %s33_s18 }
   0xc   :  { %p856_p3 = scmp.ne.s32.totalorder %s33_s18, %s855_s28  ;;  %p861_p5 = scmp.lt.s32.totalorder %s855_s28, %s855_s28 }
   0xe   :  { %p862_p6 = por %p861_p5, %p860_p4 }
  0x10   :  { %p863_p7 = pnand %p862_p6, %p856_p3 }
  0x12   :  { %866 = shalt.err (!%p863_p7)
}
  0x13   :  { %s965_s29 = smov 128   ;;  %s966_s30 = smov 8  }
  0x14   :  { %38 = dma.hbm_to_vmem [thread:$0]  %s1147_s2, 1024, %s33_s18, [#allocation8], %s965_s29, %s965_s29, %s966_s30  }
  0x15   :  { %s867_s10 = scalar_lea.hbm %s1146_s1, 1024 }
  0x16   :  { %p868_p8 = scmp.ne.s32.totalorder %s1146_s1, %s867_s10  ;;  %p871_p9 = scmp.lt.u32.totalorder %s867_s10, %s1146_s1 }
  0x18   :  { %p873_p10 = pnand %p871_p9, %p868_p8 }
  0x1a   :  { %876 = shalt.err (!%p873_p10)
}
  0x1b   :  { %s877_s15 = scalar_lea.vmem %s1000_s20, 1024  ;;  %p882_p12 = scmp.lt.s32.totalorder %s1000_s20, %s1000_s20 }
  0x1c   :  { %p878_p11 = scmp.ne.s32.totalorder %s1000_s20, %s877_s15  ;;  %p883_p13 = scmp.lt.s32.totalorder %s877_s15, %s877_s15 }
  0x1e   :  { %p884_p0 = por %p883_p13, %p882_p12 }
  0x20   :  { %p885_p1 = pnand %p884_p0, %p878_p11 }
  0x22   :  { %888 = shalt.err (!%p885_p1)
}
  0x23   :  { %26 = dma.hbm_to_vmem [thread:$0]  %s1146_s1, 1024, %s1000_s20, [#allocation5], %s965_s29, %s965_s29, %s966_s30  }
  0x24   :  { %s967_s17 = smov [#allocation9]   ;;  %s968_s18 = smov [#allocation10]  }
  0x25   :  { %s44_s0 = sshll.u32 %s967_s17, 4  ;;  %s56_s19 = sshll.u32 %s968_s18, 4  ;;  %s45_s0 = int_to_ptr.vmem [resolvable:$true] %s44_s0  ;;  %s1037_s19 = int_to_ptr.vmem [resolvable:$true] %s56_s19 }
  0x26   :  { %s889_s23 = scalar_lea.hbm %s1148_s3, 1024 }
  0x27   :  { %p890_p2 = scmp.ne.s32.totalorder %s1148_s3, %s889_s23  ;;  %p893_p3 = scmp.lt.u32.totalorder %s889_s23, %s1148_s3 }
  0x29   :  { %p895_p4 = pnand %p893_p3, %p890_p2 }
  0x2b   :  { %898 = shalt.err (!%p895_p4)
}
  0x2c   :  { %s899_s1 = scalar_lea.vmem %s45_s0, 1024  ;;  %p904_p6 = scmp.lt.s32.totalorder %s45_s0, %s45_s0 }
  0x2d   :  { %p900_p5 = scmp.ne.s32.totalorder %s45_s0, %s899_s1  ;;  %p905_p7 = scmp.lt.s32.totalorder %s899_s1, %s899_s1 }
  0x2f   :  { %p906_p8 = por %p905_p7, %p904_p6 }
  0x31   :  { %p907_p9 = pnand %p906_p8, %p900_p5 }
  0x33   :  { %910 = shalt.err (!%p907_p9)
}
  0x34   :  { %50 = dma.hbm_to_vmem [thread:$0]  %s1148_s3, 1024, %s45_s0, [#allocation8], %s965_s29, %s965_s29, %s966_s30  }
  0x35   :  { %s911_s8 = scalar_lea.hbm %s1149_s4, 2048 }
  0x36   :  { %p912_p10 = scmp.ne.s32.totalorder %s1149_s4, %s911_s8  ;;  %p915_p11 = scmp.lt.u32.totalorder %s911_s8, %s1149_s4 }
  0x38   :  { %p917_p12 = pnand %p915_p11, %p912_p10 }
  0x3a   :  { %920 = shalt.err (!%p917_p12)
}
  0x3b   :  { %s921_s13 = scalar_lea.vmem %s1037_s19, 2048  ;;  %p926_p0 = scmp.lt.s32.totalorder %s1037_s19, %s1037_s19 }
  0x3c   :  { %p922_p13 = scmp.ne.s32.totalorder %s1037_s19, %s921_s13  ;;  %p927_p1 = scmp.lt.s32.totalorder %s921_s13, %s921_s13 }
  0x3e   :  { %p928_p2 = por %p927_p1, %p926_p0 }
  0x40   :  { %p929_p3 = pnand %p928_p2, %p922_p13 }
  0x42   :  { %932 = shalt.err (!%p929_p3)
}
  0x43   :  { %62 = dma.hbm_to_vmem [thread:$0]  %s1149_s4, 2048, %s1037_s19, [#allocation11], %s965_s29, %s965_s29, %s966_s30  }
  0x44   :  { %955 = dma.done.wait [#allocation5], 1024  }
  0x45   :  { %956 = vsyncadd [#allocation5], 4294966272 }
  0x46   :  { %957 = dma.done.wait [#allocation8], 2048  }
  0x47   :  { %958 = vsyncadd [#allocation8], 4294965248 }
  0x48   :  { %959 = dma.done.wait [#allocation11], 2048  }
  0x49   :  { %960 = vsyncadd [#allocation11], 4294965248  ;;  %v83_v0 = vld [vmem:[#allocation7] sm:$0xff]  ;;  %v84_v1 = vld [vmem:[#allocation7 + $0x8] sm:$0xff]  ;;  %vm204_vm0 = vcmask 523264   ;;  %s969_s4 = smov [#allocation12]  }
  0x4a   :  { %v85_v2 = vld [vmem:[#allocation7 + $0x10] sm:$0xff]  ;;  %v742_v3 = vpack.c.bf16 %v84_v1, %v83_v0  ;;  %v86_v4 = vld [vmem:[#allocation7 + $0x18] sm:$0xff]  ;;  %v75_v6 = vld [vmem:[#allocation4] sm:$0xff]  ;;  %s564_s15 = sshll.u32 %s969_s4, 4  ;;  %s565_s15 = int_to_ptr.vmem [resolvable:$true] %s564_s15 }
  0x4b   :  { %v746_v5 = vpack.c.bf16 %v86_v4, %v85_v2  ;;  %658 = vmatprep.mubr.f32.mxu0 %v75_v6  ;;  %v87_v7 = vld [vmem:[#allocation7 + $0x20] sm:$0xff]  ;;  %v88_v8 = vld [vmem:[#allocation7 + $0x28] sm:$0xff]  ;;  %v89_v10 = vld [vmem:[#allocation7 + $0x30] sm:$0xff]  ;;  %s933_s2 = scalar_lea.vmem %s565_s15, 1024  ;;  %p938_p5 = scmp.lt.s32.totalorder %s565_s15, %s565_s15 }
  0x4c   :  { %743 = vmatprep.subr.bf16.mxu0 %v742_v3  ;;  %v750_v9 = vpack.c.bf16 %v88_v8, %v87_v7  ;;  %v90_v11 = vld [vmem:[#allocation7 + $0x38] sm:$0xff]  ;;  %v76_v13 = vld [vmem:[#allocation4 + $0x8] sm:$0xff]  ;;  %v77_v14 = vld [vmem:[#allocation4 + $0x10] sm:$0xff]  ;;  %p934_p4 = scmp.ne.s32.totalorder %s565_s15, %s933_s2  ;;  %p939_p6 = scmp.lt.s32.totalorder %s933_s2, %s933_s2 }
  0x4d   :  { %745 = vmatpush3.bf16.xpose.msra.mxu0 %v742_v3  ;;  %v754_v12 = vpack.c.bf16 %v90_v11, %v89_v10  ;;  %v78_v15 = vld [vmem:[#allocation4 + $0x18] sm:$0xff]  ;;  %v79_v16 = vld [vmem:[#allocation4 + $0x20] sm:$0xff]  ;;  %v80_v17 = vld [vmem:[#allocation4 + $0x28] sm:$0xff] }
  0x4e   :  { %747 = vmatprep.subr.bf16.mxu0 %v746_v5  ;;  %v81_v18 = vld [vmem:[#allocation4 + $0x30] sm:$0xff]  ;;  %v82_v19 = vld [vmem:[#allocation4 + $0x38] sm:$0xff]  ;;  %p940_p7 = por %p939_p6, %p938_p5 }
  0x50   :  { %p941_p8 = pnand %p940_p7, %p934_p4 }
  0x55   :  { %749 = vmatpush3.bf16.xpose.msra.mxu0 %v746_v5 }
  0x56   :  { %751 = vmatprep.subr.bf16.mxu0 %v750_v9 }
  0x5d   :  { %753 = vmatpush3.bf16.xpose.msra.mxu0 %v750_v9 }
  0x5e   :  { %755 = vmatprep.subr.bf16.mxu0 %v754_v12 }
  0x65   :  { %757 = vmatpush3.bf16.xpose.msra.mxu0 %v754_v12 }
  0x6c   :  { %659 = vmatmul.mubr.f32.vlgmr.msra.gmra.mrb[0].mxu0 %v76_v13 }
  0x6d   :  { %661 = vmatprep.mubr.f32.mxu0 %v77_v14 }
  0x70   :  { %662 = vmatmul.mubr.f32.gmra.mrb[2].mxu0 %v78_v15 }
  0x71   :  { %664 = vmatprep.mubr.f32.mxu0 %v79_v16 }
  0x74   :  { %665 = vmatmul.mubr.f32.gmra.mrb[4].mxu0 %v80_v17 }
  0x75   :  { %667 = vmatprep.mubr.f32.mxu0 %v81_v18  ;;  %v293_v18 = vld [vmem:[#allocation9] sm:$0xff] }
  0x78   :  { %668 = vmatmul.mubr.f32.gmra.mrb[6].mxu0 %v82_v19  ;;  %v294_v19 = vld [vmem:[#allocation9 + $0x8] sm:$0xff] }
 0x13f   :  { %v660_v20 = vpop.f32.mrb[0].mxu0 }
 0x140   :  { %v157_v21 = vpop.f32.mrb[1].mxu0  ;;  %v197_v23 = vmul.f32 0.17677669, %v660_v20 }
 0x141   :  { %v196_v22 = vmul.f32 0.17677669, %v157_v21  ;;  %v758_v21 = vpack.c.bf16 %v294_v19, %v293_v18 }
 0x142   :  { %v208_v30 = vsel %vm204_vm0, %v197_v23, -inf }
 0x143   :  { %v663_v24 = vpop.f32.mrb[2].mxu0  ;;  %v205_v25 = vsel %vm204_vm0, %v196_v22, -inf  ;;  %759 = vmatprep.subr.bf16.mxu1 %v758_v21 }
 0x144   :  { %206 = vmax.xlane.f32.xlu0 %v205_v25  ;;  %v167_v26 = vpop.f32.mrb[3].mxu0  ;;  %v199_v28 = vmul.f32 0.17677669, %v663_v24  ;;  %761 = vmatpush3.bf16.msra.mxu1 %v758_v21  ;;  %v296_v24 = vld [vmem:[#allocation9 + $0x18] sm:$0xff] }
 0x145   :  { %v198_v27 = vmul.f32 0.17677669, %v167_v26  ;;  %v297_v26 = vld [vmem:[#allocation9 + $0x20] sm:$0xff] }
 0x146   :  { %v214_v36 = vsel %vm204_vm0, %v199_v28, -inf }
 0x147   :  { %v666_v29 = vpop.f32.mrb[4].mxu0  ;;  %v211_v31 = vsel %vm204_vm0, %v198_v27, -inf }
 0x148   :  { %209 = vmax.xlane.f32.xlu0 %v208_v30  ;;  %212 = vmax.xlane.f32.xlu1 %v211_v31  ;;  %v177_v32 = vpop.f32.mrb[5].mxu0  ;;  %v201_v34 = vmul.f32 0.17677669, %v666_v29  ;;  %v299_v29 = vld [vmem:[#allocation9 + $0x30] sm:$0xff]  ;;  %v300_v30 = vld [vmem:[#allocation9 + $0x38] sm:$0xff] }
 0x149   :  { %v200_v33 = vmul.f32 0.17677669, %v177_v32  ;;  %v770_v31 = vpack.c.bf16 %v300_v30, %v299_v29  ;;  %v430_v32 = vld [vmem:[#allocation10] sm:$0xff] }
 0x14a   :  { %v220_v41 = vsel %vm204_vm0, %v201_v34, -inf }
 0x14b   :  { %v669_v35 = vpop.f32.mrb[6].mxu0  ;;  %v217_v37 = vsel %vm204_vm0, %v200_v33, -inf }
 0x14c   :  { %215 = vmax.xlane.f32.xlu1 %v214_v36  ;;  %218 = vmax.xlane.f32.xlu0 %v217_v37  ;;  %v187_v38 = vpop.f32.mrb[7].mxu0  ;;  %v203_v40 = vmul.f32 0.17677669, %v669_v35 }
 0x14d   :  { %v202_v39 = vmul.f32 0.17677669, %v187_v38 }
 0x14e   :  { %v226_v43 = vsel %vm204_vm0, %v203_v40, -inf }
 0x14f   :  { %v223_v42 = vsel %vm204_vm0, %v202_v39, -inf }
 0x150   :  { %221 = vmax.xlane.f32.xlu1 %v220_v41  ;;  %224 = vmax.xlane.f32.xlu0 %v223_v42 }
 0x154   :  { %227 = vmax.xlane.f32.xlu1 %v226_v43 }
 0x1d1   :  { %v207_v44 = vpop.xlane.xlu0 %206 }
 0x1d2   :  { %v229_v45 = vsub.f32 %v196_v22, %v207_v44  ;;  %v432_v44 = vld [vmem:[#allocation10 + $0x10] sm:$0xff] }
 0x1d4   :  { %v237_v46 = vmul.f32 1.442695, %v229_v45  ;;  %v433_v45 = vld [vmem:[#allocation10 + $0x18] sm:$0xff] }
 0x1d5   :  { %v210_v47 = vpop.xlane.xlu0 %209  ;;  %v213_v48 = vpop.xlane.xlu1 %212 }
 0x1d6   :  { %813 = vpow2.f32 %v237_v46  ;;  %v230_v49 = vsub.f32 %v197_v23, %v210_v47  ;;  %v231_v50 = vsub.f32 %v198_v27, %v213_v48  ;;  %v295_v23 = vld [vmem:[#allocation9 + $0x10] sm:$0xff]  ;;  %v298_v27 = vld [vmem:[#allocation9 + $0x28] sm:$0xff] }
 0x1d7   :  { %v762_v25 = vpack.c.bf16 %v296_v24, %v295_v23 }
 0x1d8   :  { %v239_v51 = vmul.f32 1.442695, %v230_v49  ;;  %v241_v52 = vmul.f32 1.442695, %v231_v50  ;;  %v778_v50 = vpack.c.bf16 %v433_v45, %v432_v44 }
 0x1d9   :  { %v216_v53 = vpop.xlane.xlu1 %215  ;;  %v219_v54 = vpop.xlane.xlu0 %218  ;;  %763 = vmatprep.subr.bf16.mxu1 %v762_v25 }
 0x1da   :  { %815 = vpow2.f32 %v239_v51  ;;  %v232_v55 = vsub.f32 %v199_v28, %v216_v53  ;;  %v233_v56 = vsub.f32 %v200_v33, %v219_v54  ;;  %765 = vmatpush3.bf16.msra.mxu1 %v762_v25  ;;  %v766_v28 = vpack.c.bf16 %v298_v27, %v297_v26  ;;  %v431_v33 = vld [vmem:[#allocation10 + $0x8] sm:$0xff] }
 0x1db   :  { %817 = vpow2.f32 %v241_v52  ;;  %v434_v52 = vld [vmem:[#allocation10 + $0x20] sm:$0xff]  ;;  %v435_v53 = vld [vmem:[#allocation10 + $0x28] sm:$0xff] }
 0x1dc   :  { %v243_v57 = vmul.f32 1.442695, %v232_v55  ;;  %v245_v58 = vmul.f32 1.442695, %v233_v56  ;;  %767 = vmatprep.subr.bf16.mxu1 %v766_v28 }
 0x1dd   :  { %v222_v59 = vpop.xlane.xlu1 %221  ;;  %v225_v60 = vpop.xlane.xlu0 %224 }
 0x1de   :  { %819 = vpow2.f32 %v243_v57  ;;  %v234_v61 = vsub.f32 %v201_v34, %v222_v59  ;;  %v235_v62 = vsub.f32 %v202_v39, %v225_v60  ;;  %769 = vmatpush3.bf16.msra.mxu1 %v766_v28  ;;  %v774_v34 = vpack.c.bf16 %v431_v33, %v430_v32  ;;  %v436_v59 = vld [vmem:[#allocation10 + $0x30] sm:$0xff]  ;;  %v437_v60 = vld [vmem:[#allocation10 + $0x38] sm:$0xff] }
 0x1df   :  { %821 = vpow2.f32 %v245_v58  ;;  %771 = vmatprep.subr.bf16.mxu1 %v770_v31  ;;  %v782_v57 = vpack.c.bf16 %v435_v53, %v434_v52 }
 0x1e0   :  { %v1082_v63 = vpop.eup %813  ;;  %v247_v0 = vmul.f32 1.442695, %v234_v61  ;;  %v249_v1 = vmul.f32 1.442695, %v235_v62 }
 0x1e1   :  { %v228_v2 = vpop.xlane.xlu1 %227  ;;  %v253_v3 = vsel %vm204_vm0, %v1082_v63, 0.0 }
 0x1e2   :  { %823 = vpow2.f32 %v247_v0  ;;  %v236_v4 = vsub.f32 %v203_v40, %v228_v2  ;;  %254 = vadd.xlane.f32.xlu0 %v253_v3  ;;  %773 = vmatpush3.bf16.msra.mxu1 %v770_v31  ;;  %v786_v0 = vpack.c.bf16 %v437_v60, %v436_v59  ;;  %v438_v2 = vld [vmem:[#allocation10 + $0x40] sm:$0xff]  ;;  %v439_v3 = vld [vmem:[#allocation10 + $0x48] sm:$0xff] }
 0x1e3   :  { %825 = vpow2.f32 %v249_v1  ;;  %775 = vmatprep.subr.bf16.mxu1 %v774_v34 }
 0x1e4   :  { %v1086_v5 = vpop.eup %815  ;;  %v251_v6 = vmul.f32 1.442695, %v236_v4 }
 0x1e5   :  { %v1088_v7 = vpop.eup %817  ;;  %v256_v8 = vsel %vm204_vm0, %v1086_v5, 0.0 }
 0x1e6   :  { %827 = vpow2.f32 %v251_v6  ;;  %257 = vadd.xlane.f32.xlu1 %v256_v8  ;;  %v259_v9 = vsel %vm204_vm0, %v1088_v7, 0.0  ;;  %v790_v6 = vpack.c.bf16 %v439_v3, %v438_v2  ;;  %v441_v8 = vld [vmem:[#allocation10 + $0x58] sm:$0xff] }
 0x1e7   :  { %260 = vadd.xlane.f32.xlu0 %v259_v9 }
 0x1e8   :  { %v1094_v10 = vpop.eup %819 }
 0x1e9   :  { %v1096_v11 = vpop.eup %821  ;;  %v262_v12 = vsel %vm204_vm0, %v1094_v10, 0.0 }
 0x1ea   :  { %263 = vadd.xlane.f32.xlu1 %v262_v12  ;;  %v265_v13 = vsel %vm204_vm0, %v1096_v11, 0.0 }
 0x1eb   :  { %266 = vadd.xlane.f32.xlu0 %v265_v13  ;;  %v444_v13 = vld [vmem:[#allocation10 + $0x70] sm:$0xff] }
 0x1ec   :  { %v1102_v14 = vpop.eup %823 }
 0x1ed   :  { %v1104_v15 = vpop.eup %825  ;;  %v268_v16 = vsel %vm204_vm0, %v1102_v14, 0.0 }
 0x1ee   :  { %269 = vadd.xlane.f32.xlu1 %v268_v16  ;;  %v271_v17 = vsel %vm204_vm0, %v1104_v15, 0.0 }
 0x1ef   :  { %272 = vadd.xlane.f32.xlu0 %v271_v17 }
 0x1f0   :  { %v1110_v20 = vpop.eup %827 }
 0x1f1   :  { %v274_v22 = vsel %vm204_vm0, %v1110_v20, 0.0 }
 0x1f2   :  { %275 = vadd.xlane.f32.xlu1 %v274_v22 }
 0x26f   :  { %v255_v35 = vpop.xlane.xlu0 %254 }
 0x270   :  { %829 = vrcp.f32 %v255_v35 }
 0x273   :  { %v258_v36 = vpop.xlane.xlu1 %257 }
 0x274   :  { %831 = vrcp.f32 %v258_v36  ;;  %v261_v37 = vpop.xlane.xlu0 %260 }
 0x275   :  { %833 = vrcp.f32 %v261_v37 }
 0x277   :  { %v264_v38 = vpop.xlane.xlu1 %263 }
 0x278   :  { %835 = vrcp.f32 %v264_v38  ;;  %v267_v39 = vpop.xlane.xlu0 %266 }
 0x279   :  { %837 = vrcp.f32 %v267_v39 }
 0x27a   :  { %v830_v40 = vpop.eup %829 }
 0x27b   :  { %v270_v41 = vpop.xlane.xlu1 %269  ;;  %v278_v42 = vmul.f32 %v830_v40, %v1082_v63 }
 0x27c   :  { %839 = vrcp.f32 %v270_v41  ;;  %v273_v43 = vpop.xlane.xlu0 %272 }
 0x27d   :  { %841 = vrcp.f32 %v273_v43  ;;  %686 = vmatprep.mubr.msk.f32.mxu1 %vm204_vm0, %v278_v42 }
 0x27e   :  { %v832_v46 = vpop.eup %831 }
 0x27f   :  { %v834_v47 = vpop.eup %833  ;;  %v276_v48 = vpop.xlane.xlu1 %275  ;;  %v280_v49 = vmul.f32 %v832_v46, %v1086_v5 }
 0x280   :  { %843 = vrcp.f32 %v276_v48  ;;  %v282_v51 = vmul.f32 %v834_v47, %v1088_v7  ;;  %v440_v7 = vld [vmem:[#allocation10 + $0x50] sm:$0xff] }
 0x281   :  { %687 = vmatmul.mubr.msk.f32.vlgmr.msra.gmra.mrb[0].mxu1 %vm204_vm0, %v280_v49  ;;  %v794_v9 = vpack.c.bf16 %v441_v8, %v440_v7 }
 0x282   :  { %v836_v54 = vpop.eup %835  ;;  %689 = vmatprep.mubr.msk.f32.mxu1 %vm204_vm0, %v282_v51  ;;  %777 = vmatpush3.bf16.msra.mxu1 %v774_v34 }
 0x283   :  { %v838_v55 = vpop.eup %837  ;;  %v284_v56 = vmul.f32 %v836_v54, %v1094_v10  ;;  %779 = vmatprep.subr.bf16.mxu1 %v778_v50  ;;  %v442_v10 = vld [vmem:[#allocation10 + $0x60] sm:$0xff] }
 0x284   :  { %v286_v58 = vmul.f32 %v838_v55, %v1096_v11  ;;  %v443_v11 = vld [vmem:[#allocation10 + $0x68] sm:$0xff] }
 0x285   :  { %690 = vmatmul.mubr.msk.f32.gmra.mrb[2].mxu1 %vm204_vm0, %v284_v56  ;;  %v798_v12 = vpack.c.bf16 %v443_v11, %v442_v10 }
 0x286   :  { %v840_v61 = vpop.eup %839  ;;  %692 = vmatprep.mubr.msk.f32.mxu1 %vm204_vm0, %v286_v58  ;;  %781 = vmatpush3.bf16.msra.mxu1 %v778_v50 }
 0x287   :  { %v842_v62 = vpop.eup %841  ;;  %v288_v63 = vmul.f32 %v840_v61, %v1102_v14  ;;  %783 = vmatprep.subr.bf16.mxu1 %v782_v57  ;;  %v445_v14 = vld [vmem:[#allocation10 + $0x78] sm:$0xff] }
 0x288   :  { %v290_v1 = vmul.f32 %v842_v62, %v1104_v15  ;;  %v802_v15 = vpack.c.bf16 %v445_v14, %v444_v13 }
 0x289   :  { %693 = vmatmul.mubr.msk.f32.gmra.mrb[4].mxu1 %vm204_vm0, %v288_v63 }
 0x28a   :  { %v844_v4 = vpop.eup %843  ;;  %695 = vmatprep.mubr.msk.f32.mxu1 %vm204_vm0, %v290_v1  ;;  %785 = vmatpush3.bf16.msra.mxu1 %v782_v57 }
 0x28b   :  { %v292_v5 = vmul.f32 %v844_v4, %v1110_v20  ;;  %787 = vmatprep.subr.bf16.mxu1 %v786_v0 }
 0x28d   :  { %696 = vmatmul.mubr.msk.f32.gmra.mrb[6].mxu1 %vm204_vm0, %v292_v5 }
 0x28e   :  { %789 = vmatpush3.bf16.msra.mxu1 %v786_v0 }
 0x28f   :  { %791 = vmatprep.subr.bf16.mxu1 %v790_v6 }
 0x292   :  { %793 = vmatpush3.bf16.msra.mxu1 %v790_v6 }
 0x293   :  { %795 = vmatprep.subr.bf16.mxu1 %v794_v9 }
 0x296   :  { %797 = vmatpush3.bf16.msra.mxu1 %v794_v9 }
 0x297   :  { %799 = vmatprep.subr.bf16.mxu1 %v798_v12 }
 0x29a   :  { %801 = vmatpush3.bf16.msra.mxu1 %v798_v12 }
 0x29b   :  { %803 = vmatprep.subr.bf16.mxu1 %v802_v15 }
 0x29e   :  { %805 = vmatpush3.bf16.msra.mxu1 %v802_v15 }
 0x354   :  { %v688_v16 = vpop.f32.mrb[0].mxu1 }
 0x355   :  { %v391_v17 = vpop.f32.mrb[1].mxu1 }
 0x356   :  { %730 = vmatprep.mubr.f32.mxu1 %v391_v17 }
 0x357   :  { %731 = vmatmul.mubr.f32.vlgmr.msra.gmra.mrb[8].mxu1 %v688_v16 }
 0x358   :  { %v691_v18 = vpop.f32.mrb[2].mxu1 }
 0x359   :  { %v401_v19 = vpop.f32.mrb[3].mxu1 }
 0x35a   :  { %733 = vmatprep.mubr.f32.mxu1 %v401_v19 }
 0x35b   :  { %734 = vmatmul.mubr.f32.gmra.mrb[10].mxu1 %v691_v18 }
 0x35c   :  { %v694_v20 = vpop.f32.mrb[4].mxu1 }
 0x35d   :  { %v411_v21 = vpop.f32.mrb[5].mxu1 }
 0x35e   :  { %736 = vmatprep.mubr.f32.mxu1 %v411_v21 }
 0x35f   :  { %737 = vmatmul.mubr.f32.gmra.mrb[12].mxu1 %v694_v20 }
 0x360   :  { %v697_v22 = vpop.f32.mrb[6].mxu1 }
 0x361   :  { %v421_v23 = vpop.f32.mrb[7].mxu1 }
 0x362   :  { %739 = vmatprep.mubr.f32.mxu1 %v421_v23 }
 0x363   :  { %740 = vmatmul.mubr.f32.gmra.mrb[14].mxu1 %v697_v22 }
 0x42a   :  { %v732_v24 = vpop.f32.mrb[8].mxu1 }
 0x42b   :  { %552 = vst [vmem:[#allocation12 + $0x8] sm:$0xff] %v732_v24  ;;  %v512_v25 = vpop.f32.mrb[9].mxu1 }
 0x42c   :  { %551 = vst [vmem:[#allocation12] sm:$0xff] %v512_v25 }
 0x42e   :  { %v735_v26 = vpop.f32.mrb[10].mxu1 }
 0x42f   :  { %554 = vst [vmem:[#allocation12 + $0x18] sm:$0xff] %v735_v26  ;;  %v522_v27 = vpop.f32.mrb[11].mxu1 }
 0x430   :  { %553 = vst [vmem:[#allocation12 + $0x10] sm:$0xff] %v522_v27 }
 0x432   :  { %v738_v28 = vpop.f32.mrb[12].mxu1 }
 0x433   :  { %556 = vst [vmem:[#allocation12 + $0x28] sm:$0xff] %v738_v28  ;;  %v532_v29 = vpop.f32.mrb[13].mxu1 }
 0x434   :  { %555 = vst [vmem:[#allocation12 + $0x20] sm:$0xff] %v532_v29 }
 0x436   :  { %v741_v30 = vpop.f32.mrb[14].mxu1 }
 0x437   :  { %558 = vst [vmem:[#allocation12 + $0x38] sm:$0xff] %v741_v30  ;;  %v542_v31 = vpop.f32.mrb[15].mxu1 }
 0x438   :  { %557 = vst [vmem:[#allocation12 + $0x30] sm:$0xff] %v542_v31 }
 0x439   :  { %944 = shalt.err (!%p941_p8)
}
 0x43a   :  { %s945_s0 = scalar_lea.hbm %s1150_s5, 1024 }
 0x43b   :  { %p946_p9 = scmp.ne.s32.totalorder %s1150_s5, %s945_s0  ;;  %p949_p10 = scmp.lt.u32.totalorder %s945_s0, %s1150_s5 }
 0x43d   :  { %p951_p11 = pnand %p949_p10, %p946_p9 }
 0x43f   :  { %954 = shalt.err (!%p951_p11)
}
 0x440   :  { %570 = dma.vmem_to_hbm [thread:$0]  %s565_s15, 1024, %s1150_s5, [#allocation6], %s965_s29, %s965_s29, %s966_s30  }
 0x441   :  { %961 = dma.done.wait [#allocation6], 1024  }
 0x442   :  { %962 = vsyncadd [#allocation6], 4294966272 }
 0x443   :  { %574 = vsyncpa [#allocation5], 1 }
 0x444   :  { %575 = vsyncpa [#allocation8], 1 }
 0x445   :  { %576 = vsyncpa [#allocation11], 1 }
 0x446   :  { %577 = vsyncpa [#allocation6], 1 }

</bundles_post_ra>
